<compile_context>
chip_gen: v6e
topology: v6e:2x2x1
jax: 0.10.0
libtpu: 0.0.40
codegen_flags: <defaults>
</compile_context>

<pallas_src>
import functools

import jax
import jax.numpy as jnp
import numpy as np
from jax.experimental import pallas as pl
from jax.experimental.pallas import tpu as pltpu

BIG = 1e30           # "infinity" masking other-batch points
KNOCK = 2e30         # knock-out value, > any packed masked distance
EPS_W = 1e-16        # torch_geometric clamp on squared distance
BN_EPS = 1e-5


def _round_up(v, m):
    return (v + m - 1) // m * m


def fp_module_kernel(x_ref, pos_t_ref, x_skip_ref, pos_skip_ref,
                     w1_ref, w2_ref, vec_ref, out_ref, *, k):
    x = x_ref[...]                    # (Np, Cp)  coarse features, bf16, resident
    pos_t = pos_t_ref[...]            # (8, Np)   augmented coarse coords, f32
    x_skip = x_skip_ref[...]          # (TM, Csp) skip features, bf16, streamed
    pos_skip = pos_skip_ref[...]      # (TM, 8)   augmented fine coords, f32

    tm = pos_skip.shape[0]
    n = pos_t.shape[1]

    # ---- pairwise squared distances fused into ONE 8-deep MXU contraction ----
    # pos_skip cols: [a_x,a_y,a_z, |a|^2, 1, batch_a, 0, 0]
    # pos_t rows:    [-2b_x;-2b_y;-2b_z; 1; |b|^2; 0; batch_b; 0]
    # => dot = |a|^2 + |b|^2 - 2 a.b     (batch lanes hit zeros on the other side)
    # Clamp straight to EPS_W: matches the reference weight clamp, absorbs f32
    # cancellation negatives, and keeps every packed value a *normal* float.
    dist = jnp.maximum(
        jnp.dot(pos_skip, pos_t, preferred_element_type=jnp.float32), EPS_W)

    # same-batch mask (batch ids travel as float lanes of the augmented coords;
    # coarse padding = -1, fine padding = -2, so padded rows/cols never match)
    same = pos_skip[:, 5:6] == pos_t[6:7, :]
    dist = jnp.where(same, dist, BIG)

    # ---- k-NN selection: pack the column index into the low mantissa bits so a
    #      single cross-lane min yields (distance, argmin) and the equality
    #      compare is an exact one-hot (packed values are unique per row). ----
    nbits = max(1, (n - 1).bit_length())        # static; n < 2^23 assumed
    keep = jnp.int32(-(1 << nbits))             # clears the low nbits bits
    col = jax.lax.broadcasted_iota(jnp.int32, (tm, n), 1)
    packed = pltpu.bitcast(
        (pltpu.bitcast(dist, jnp.int32) & keep) | col, jnp.float32)

    wmat = jnp.zeros((tm, n), jnp.float32)
    for _ in range(k):                          # k is small and static -> unrolled
        pmin = jnp.min(packed, axis=1, keepdims=True)   # ONE XLU reduce / iter
        sel = packed == pmin                            # exact one-hot
        # low index bits perturb pmin by <= 2^-(23-nbits) relative: negligible.
        w = pl.reciprocal(pmin, approx=True)            # EUP, (TM,1)
        wmat = jnp.where(sel, w, wmat)                  # each column picked once
        packed = jnp.where(sel, KNOCK, packed)          # knock out the pick
        # If a batch has < k coarse points, extra ~1e-30 weights are picked up;
        # numerically negligible and consistent with the reference.

    # ---- normalise in f32 BEFORE the bf16 cast (weights land in [0,1]) ----
    acc_w = jnp.sum(wmat, axis=1, keepdims=True)        # (TM,1), always > 0
    wnorm = (wmat * (1.0 / acc_w)).astype(jnp.bfloat16)
    y = jnp.dot(wnorm, x, preferred_element_type=jnp.float32)   # bf16 MXU gather

    # ---- MLP: concat([y, x_skip]) @ W1 as a single 256-deep bf16 contraction ----
    vec = vec_ref[...]
    b1, b2, s2, t2 = vec[0:1, :], vec[1:2, :], vec[2:3, :], vec[3:4, :]

    h_in = jnp.concatenate([y.astype(jnp.bfloat16), x_skip], axis=-1)
    h = jnp.dot(h_in, w1_ref[...], preferred_element_type=jnp.float32) + b1
    h = jnp.maximum(h, 0.0)
    # BN1 (eval) already folded into W2/b2 on the host.
    h = jnp.dot(h.astype(jnp.bfloat16), w2_ref[...],
                preferred_element_type=jnp.float32) + b2
    h = jnp.maximum(h, 0.0)
    out_ref[...] = h * s2 + t2                           # BN2 folded scale/shift


def _pick_tiling(m, n_pad, c_pad, cs_pad, h_pad):
    """Derive (TM, vmem_limit) from the per-TensorCore VMEM capacity."""
    try:
        vmem_phys = int(pltpu.get_tpu_info().vmem_capacity_bytes)
    except Exception:                    # conservative fallback = v7x per-TC VMEM
        vmem_phys = 64 * 1024 * 1024
    budget = min(vmem_phys * 3 // 4, 96 * 1024 * 1024)

    # resident, double-buffered constant blocks (coarse x and weights in bf16)
    resident = 2 * (n_pad * c_pad * 2 + 8 * n_pad * 4
                    + (c_pad + cs_pad) * h_pad * 2
                    + h_pad * h_pad * 2 + 8 * h_pad * 4)

    m8 = _round_up(max(m, 8), 8)
    cands = sorted({t for t in (512, 384, 256, 128, 64, 32, 16, 8, m8) if t <= m8},
                   reverse=True)
    for tm in cands:
        per_tile = (2 * (tm * cs_pad * 2 + tm * 8 * 4 + tm * h_pad * 4)  # 2x-buffered IO
                    + 5 * tm * n_pad * 4                                 # dist/packed/sel/wmat
                    + tm * (c_pad + cs_pad) * 2 + 2 * tm * h_pad * 4)    # h_in, h, y
        if resident + per_tile <= budget:
            return tm, budget
    return 8, budget


def fp_module_forward(x, pos, batch, x_skip, pos_skip, batch_skip, params,
                      k=3, tm=None):
    """Pallas FPModule.forward. Returns (x_out, pos_skip, batch_skip)."""
    x = jnp.asarray(x, jnp.float32)
    pos = jnp.asarray(pos, jnp.float32)
    batch_f = jnp.asarray(batch, jnp.int32).astype(jnp.float32)
    x_skip_a = jnp.asarray(x_skip, jnp.float32)
    pos_skip_a = jnp.asarray(pos_skip, jnp.float32)
    batch_skip_f = jnp.asarray(batch_skip, jnp.int32).astype(jnp.float32)

    n, c = x.shape
    m, cs = x_skip_a.shape
    hdim = params["w2"].shape[1]

    n_pad = _round_up(n, 128)
    c_pad = _round_up(c, 128)
    cs_pad = _round_up(cs, 128)
    h_pad = _round_up(hdim, 128)

    auto_tm, vmem_budget = _pick_tiling(m, n_pad, c_pad, cs_pad, h_pad)
    if tm is None:
        tm = auto_tm
    else:
        tm = max(8, _round_up(min(tm, _round_up(m, 8)), 8))
    m_pad = _round_up(m, tm)

    # ---- coarse side: bf16 features + augmented coords (resident over the grid) ----
    x_p = jnp.zeros((n_pad, c_pad), jnp.bfloat16).at[:n, :c].set(
        x.astype(jnp.bfloat16))

    pos_t_p = jnp.zeros((8, n_pad), jnp.float32)
    pos_t_p = pos_t_p.at[:3, :n].set(-2.0 * pos.T)
    pos_t_p = pos_t_p.at[3, :].set(1.0)                       # multiplies |a|^2
    pos_t_p = pos_t_p.at[4, :n].set(jnp.sum(pos * pos, axis=1))
    pos_t_p = pos_t_p.at[6, :].set(-1.0)                      # padded batch id
    pos_t_p = pos_t_p.at[6, :n].set(batch_f)

    # ---- fine side: bf16 skip features + augmented coords (streamed per tile) ----
    x_skip_p = jnp.zeros((m_pad, cs_pad), jnp.bfloat16).at[:m, :cs].set(
        x_skip_a.astype(jnp.bfloat16))

    pos_skip_p = jnp.zeros((m_pad, 8), jnp.float32)
    pos_skip_p = pos_skip_p.at[:m, :3].set(pos_skip_a)
    pos_skip_p = pos_skip_p.at[:m, 3].set(jnp.sum(pos_skip_a * pos_skip_a, axis=1))
    pos_skip_p = pos_skip_p.at[:, 4].set(1.0)                 # multiplies |b|^2
    pos_skip_p = pos_skip_p.at[:, 5].set(-2.0)                # padded batch id
    pos_skip_p = pos_skip_p.at[:m, 5].set(batch_skip_f)

    # ---- fold BatchNorms (eval); BN1 is folded straight into W2/b2 ----
    def fold_bn(gamma, beta, rm, rv):
        s = gamma / jnp.sqrt(rv + BN_EPS)
        return s, beta - rm * s

    s1, t1 = fold_bn(params["gamma1"], params["beta1"], params["rm1"], params["rv1"])
    s2, t2 = fold_bn(params["gamma2"], params["beta2"], params["rm2"], params["rv2"])

    # merged first-layer weight acting on lane-concatenated [y (c_pad), x_skip (cs_pad)]
    w1 = params["w1"].astype(jnp.float32)
    w1_p = jnp.zeros((c_pad + cs_pad, h_pad), jnp.bfloat16)
    w1_p = w1_p.at[:c, :hdim].set(w1[:c].astype(jnp.bfloat16))
    w1_p = w1_p.at[c_pad:c_pad + cs, :hdim].set(w1[c:].astype(jnp.bfloat16))

    w2f = params["w2"] * s1[:, None]                  # diag(s1) @ W2
    b2f = params["b2"] + t1 @ params["w2"]            # b2 + t1 @ W2
    w2_p = jnp.zeros((h_pad, h_pad), jnp.bfloat16).at[:hdim, :hdim].set(
        w2f.astype(jnp.bfloat16))

    # all (1,H) vectors merged into one resident block: [b1; b2; bn2 scale; bn2 shift]
    vec_p = jnp.zeros((8, h_pad), jnp.float32)
    vec_p = vec_p.at[0, :hdim].set(params["b1"])
    vec_p = vec_p.at[1, :hdim].set(b2f)
    vec_p = vec_p.at[2, :hdim].set(s2)
    vec_p = vec_p.at[3, :hdim].set(t2)

    const = lambda i: (0, 0)     # resident across the M grid
    tile_m = lambda i: (i, 0)    # tiled over M

    out = pl.pallas_call(
        functools.partial(fp_module_kernel, k=k),
        out_shape=jax.ShapeDtypeStruct((m_pad, h_pad), jnp.float32),
        grid=(m_pad // tm,),
        in_specs=[
            pl.BlockSpec((n_pad, c_pad), const),           # coarse x (bf16)
            pl.BlockSpec((8, n_pad), const),               # augmented coarse coords + batch
            pl.BlockSpec((tm, cs_pad), tile_m),            # x_skip (bf16)
            pl.BlockSpec((tm, 8), tile_m),                 # augmented fine coords + batch
            pl.BlockSpec((c_pad + cs_pad, h_pad), const),  # merged W1 (bf16)
            pl.BlockSpec((h_pad, h_pad), const),           # W2, BN1 folded (bf16)
            pl.BlockSpec((8, h_pad), const),               # [b1; b2; s2; t2]
        ],
        out_specs=pl.BlockSpec((tm, h_pad), tile_m),
        compiler_params=pltpu.CompilerParams(
            dimension_semantics=("parallel",),
            vmem_limit_bytes=int(vmem_budget)),
    )(x_p, pos_t_p, x_skip_p, pos_skip_p, w1_p, w2_p, vec_p)

    return out[:m, :hdim], pos_skip, batch_skip


def init_params(key, c_in, hidden):
    ks = jax.random.split(key, 12)
    return {
        "w1": 0.1 * jax.random.normal(ks[0], (c_in, hidden), jnp.float32),
        "b1": 0.05 * jax.random.normal(ks[1], (hidden,), jnp.float32),
        "gamma1": 1.0 + 0.1 * jax.random.uniform(ks[2], (hidden,), jnp.float32),
        "beta1": 0.05 * jax.random.normal(ks[3], (hidden,), jnp.float32),
        "rm1": 0.01 * jax.random.normal(ks[4], (hidden,), jnp.float32),
        "rv1": 1.0 + 0.1 * jax.random.uniform(ks[5], (hidden,), jnp.float32),
        "w2": 0.1 * jax.random.normal(ks[6], (hidden, hidden), jnp.float32),
        "b2": 0.05 * jax.random.normal(ks[7], (hidden,), jnp.float32),
        "gamma2": 1.0 + 0.1 * jax.random.uniform(ks[8], (hidden,), jnp.float32),
        "beta2": 0.05 * jax.random.normal(ks[9], (hidden,), jnp.float32),
        "rm2": 0.01 * jax.random.normal(ks[10], (hidden,), jnp.float32),
        "rv2": 1.0 + 0.1 * jax.random.uniform(ks[11], (hidden,), jnp.float32),
    }


def reference_numpy(x, pos, batch, x_skip, pos_skip, batch_skip, p, k):
    x = np.asarray(x, np.float64)
    pos = np.asarray(pos, np.float64)
    pos_skip_n = np.asarray(pos_skip, np.float64)
    batch = np.asarray(batch)
    batch_skip_n = np.asarray(batch_skip)
    M = pos_skip_n.shape[0]
    y = np.zeros((M, x.shape[1]), np.float64)
    for i in range(M):
        d = np.sum((pos - pos_skip_n[i]) ** 2, axis=1)
        d = np.where(batch == batch_skip_n[i], d, np.inf)
        idx = np.argsort(d)[:k]
        w = 1.0 / np.maximum(d[idx], EPS_W)
        y[i] = (w[:, None] * x[idx]).sum(0) / w.sum()
    h = np.concatenate([y, np.asarray(x_skip, np.float64)], axis=1)

    def layer(h, w, b, gamma, beta, rm, rv):
        h = h @ np.asarray(w, np.float64) + np.asarray(b, np.float64)
        h = np.maximum(h, 0.0)
        s = np.asarray(gamma, np.float64) / np.sqrt(np.asarray(rv, np.float64) + BN_EPS)
        return h * s + (np.asarray(beta, np.float64) - np.asarray(rm, np.float64) * s)

    h = layer(h, p["w1"], p["b1"], p["gamma1"], p["beta1"], p["rm1"], p["rv1"])
    h = layer(h, p["w2"], p["b2"], p["gamma2"], p["beta2"], p["rm2"], p["rv2"])
    return h


if __name__ == "__main__":
    key = jax.random.PRNGKey(0)
    N, M, D = 8, 16, 3          # N coarse (source) points, M fine (skip) points
    C, C_skip, H = 8, 4, 32     # feature dims
    k = 3

    ks = jax.random.split(key, 4)
    x = jax.random.normal(ks[0], (N, C), jnp.float32)
    pos = jax.random.uniform(ks[1], (N, D), jnp.float32)
    x_skip = jax.random.normal(ks[2], (M, C_skip), jnp.float32)
    pos_skip = jax.random.uniform(ks[3], (M, D), jnp.float32)
    batch = jnp.array([0] * 4 + [1] * 4, jnp.int32)
    batch_skip = jnp.array([0] * 8 + [1] * 8, jnp.int32)

    params = init_params(jax.random.PRNGKey(42), C + C_skip, H)

    out, pos_out, batch_out = fp_module_forward(
        x, pos, batch, x_skip, pos_skip, batch_skip, params, k=k)
    out = jax.block_until_ready(out)

    assert out.shape == (M, H) and pos_out.shape == (M, D) and batch_out.shape == (M,)
    ref = reference_numpy(x, pos, batch, x_skip, pos_skip, batch_skip, params, k)
    np.testing.assert_allclose(np.asarray(out, np.float64), ref, rtol=5e-2, atol=5e-2)
    print("KERNEL_OK")
</pallas_src>

<mosaic_0001>
module attributes {stable_mosaic.version = 11 : i64} {
  func.func @fp_module_kernel(%arg0: i32, %arg1: memref<128x128xbf16, #tpu.memory_space<vmem>>, %arg2: memref<8x128xf32, #tpu.memory_space<vmem>>, %arg3: memref<16x128xbf16, #tpu.memory_space<vmem>>, %arg4: memref<16x8xf32, #tpu.memory_space<vmem>>, %arg5: memref<256x128xbf16, #tpu.memory_space<vmem>>, %arg6: memref<128x128xbf16, #tpu.memory_space<vmem>>, %arg7: memref<8x128xf32, #tpu.memory_space<vmem>>, %arg8: memref<16x128xf32, #tpu.memory_space<vmem>>) attributes {dimension_semantics = [#tpu.dimension_semantics<parallel>], iteration_bounds = array<i64: 1>, scalar_prefetch = 0 : i64, scratch_operands = 0 : i64, tpu.core_type = #tpu.core_type<tc>, window_params = [{pipeline_mode = #tpu.pipeline_mode<synchronous>, transform_indices = @transform_0, window_bounds = array<i64: 128, 128>}, {pipeline_mode = #tpu.pipeline_mode<synchronous>, transform_indices = @transform_1, window_bounds = array<i64: 8, 128>}, {transform_indices = @transform_2, window_bounds = array<i64: 16, 128>}, {transform_indices = @transform_3, window_bounds = array<i64: 16, 8>}, {pipeline_mode = #tpu.pipeline_mode<synchronous>, transform_indices = @transform_4, window_bounds = array<i64: 256, 128>}, {pipeline_mode = #tpu.pipeline_mode<synchronous>, transform_indices = @transform_5, window_bounds = array<i64: 128, 128>}, {pipeline_mode = #tpu.pipeline_mode<synchronous>, transform_indices = @transform_6, window_bounds = array<i64: 8, 128>}, {transform_indices = @transform_7, window_bounds = array<i64: 16, 128>}]} {
    %c0 = arith.constant 0 : index
    %c0_0 = arith.constant 0 : index
    %0 = vector.load %arg1[%c0, %c0_0] : memref<128x128xbf16, #tpu.memory_space<vmem>>, vector<128x128xbf16>
    %c0_1 = arith.constant 0 : index
    %c0_2 = arith.constant 0 : index
    %1 = vector.load %arg2[%c0_1, %c0_2] : memref<8x128xf32, #tpu.memory_space<vmem>>, vector<8x128xf32>
    %c0_3 = arith.constant 0 : index
    %c0_4 = arith.constant 0 : index
    %2 = vector.load %arg3[%c0_3, %c0_4] : memref<16x128xbf16, #tpu.memory_space<vmem>>, vector<16x128xbf16>
    %c0_5 = arith.constant 0 : index
    %c0_6 = arith.constant 0 : index
    %3 = vector.load %arg4[%c0_5, %c0_6] : memref<16x8xf32, #tpu.memory_space<vmem>>, vector<16x8xf32>
    %cst = arith.constant dense<0.000000e+00> : vector<16x128xf32>
    %4 = tpu.matmul %3, %1, %cst {dimension_numbers = #tpu.dot_dimension_numbers<[1], [0], [0], [1], [0, 0, 1, 1], [], []>} : vector<16x8xf32>, vector<8x128xf32>, vector<16x128xf32> -> vector<16x128xf32>
    %cst_7 = arith.constant 1.000000e-16 : f32
    %5 = vector.broadcast %cst_7 : f32 to vector<16x128xf32>
    %6 = arith.maximumf %4, %5 : vector<16x128xf32>
    %7 = vector.extract_strided_slice %3 {offsets = [0, 5], sizes = [16, 1], strides = [1, 1]} : vector<16x8xf32> to vector<16x1xf32>
    %8 = vector.extract_strided_slice %1 {offsets = [6, 0], sizes = [1, 128], strides = [1, 1]} : vector<8x128xf32> to vector<1x128xf32>
    %9 = vector.broadcast %7 : vector<16x1xf32> to vector<16x128xf32>
    %10 = vector.broadcast %8 : vector<1x128xf32> to vector<16x128xf32>
    %11 = arith.cmpf oeq, %9, %10 : vector<16x128xf32>
    %cst_8 = arith.constant 1.000000e+30 : f32
    %12 = vector.broadcast %cst_8 : f32 to vector<16x128xf32>
    %13 = arith.select %11, %6, %12 : vector<16x128xi1>, vector<16x128xf32>
    %14 = tpu.iota {dimensions = array<i32: 1>} : vector<16x128xi32>
    %15 = tpu.bitcast %13 : vector<16x128xf32> -> vector<16x128xi32>
    %c-128_i32 = arith.constant -128 : i32
    %16 = vector.broadcast %c-128_i32 : i32 to vector<16x128xi32>
    %17 = arith.andi %15, %16 : vector<16x128xi32>
    %18 = arith.ori %17, %14 : vector<16x128xi32>
    %19 = tpu.bitcast %18 : vector<16x128xi32> -> vector<16x128xf32>
    %cst_9 = arith.constant 0.000000e+00 : f32
    %20 = vector.broadcast %cst_9 : f32 to vector<16x128xf32>
    %cst_10 = arith.constant dense<0x7F800000> : vector<16xf32>
    %21 = vector.multi_reduction <minimumf>, %19, %cst_10 [1] : vector<16x128xf32> to vector<16xf32>
    %22 = vector.shape_cast %21 : vector<16xf32> to vector<16x1xf32>
    %23 = vector.broadcast %22 : vector<16x1xf32> to vector<16x128xf32>
    %24 = arith.cmpf oeq, %19, %23 : vector<16x128xf32>
    %25 = tpu.reciprocal %22 {approx = true} : vector<16x1xf32> -> vector<16x1xf32>
    %26 = vector.shape_cast %25 : vector<16x1xf32> to vector<16x1xf32>
    %27 = vector.broadcast %26 : vector<16x1xf32> to vector<16x128xf32>
    %28 = arith.select %24, %27, %20 : vector<16x128xi1>, vector<16x128xf32>
    %cst_11 = arith.constant 2.000000e+30 : f32
    %29 = vector.broadcast %cst_11 : f32 to vector<16x128xf32>
    %30 = arith.select %24, %29, %19 : vector<16x128xi1>, vector<16x128xf32>
    %cst_12 = arith.constant dense<0x7F800000> : vector<16xf32>
    %31 = vector.multi_reduction <minimumf>, %30, %cst_12 [1] : vector<16x128xf32> to vector<16xf32>
    %32 = vector.shape_cast %31 : vector<16xf32> to vector<16x1xf32>
    %33 = vector.broadcast %32 : vector<16x1xf32> to vector<16x128xf32>
    %34 = arith.cmpf oeq, %30, %33 : vector<16x128xf32>
    %35 = tpu.reciprocal %32 {approx = true} : vector<16x1xf32> -> vector<16x1xf32>
    %36 = vector.shape_cast %35 : vector<16x1xf32> to vector<16x1xf32>
    %37 = vector.broadcast %36 : vector<16x1xf32> to vector<16x128xf32>
    %38 = arith.select %34, %37, %28 : vector<16x128xi1>, vector<16x128xf32>
    %cst_13 = arith.constant 2.000000e+30 : f32
    %39 = vector.broadcast %cst_13 : f32 to vector<16x128xf32>
    %40 = arith.select %34, %39, %30 : vector<16x128xi1>, vector<16x128xf32>
    %cst_14 = arith.constant dense<0x7F800000> : vector<16xf32>
    %41 = vector.multi_reduction <minimumf>, %40, %cst_14 [1] : vector<16x128xf32> to vector<16xf32>
    %42 = vector.shape_cast %41 : vector<16xf32> to vector<16x1xf32>
    %43 = vector.broadcast %42 : vector<16x1xf32> to vector<16x128xf32>
    %44 = arith.cmpf oeq, %40, %43 : vector<16x128xf32>
    %45 = tpu.reciprocal %42 {approx = true} : vector<16x1xf32> -> vector<16x1xf32>
    %46 = vector.shape_cast %45 : vector<16x1xf32> to vector<16x1xf32>
    %47 = vector.broadcast %46 : vector<16x1xf32> to vector<16x128xf32>
    %48 = arith.select %44, %47, %38 : vector<16x128xi1>, vector<16x128xf32>
    %cst_15 = arith.constant dense<0.000000e+00> : vector<16xf32>
    %49 = vector.multi_reduction <add>, %48, %cst_15 [1] : vector<16x128xf32> to vector<16xf32>
    %50 = vector.shape_cast %49 : vector<16xf32> to vector<16x1xf32>
    %cst_16 = arith.constant 1.000000e+00 : f32
    %51 = vector.broadcast %cst_16 : f32 to vector<16x1xf32>
    %52 = arith.divf %51, %50 : vector<16x1xf32>
    %53 = vector.broadcast %52 : vector<16x1xf32> to vector<16x128xf32>
    %54 = arith.mulf %48, %53 : vector<16x128xf32>
    %55 = arith.truncf %54 : vector<16x128xf32> to vector<16x128xbf16>
    %cst_17 = arith.constant dense<0.000000e+00> : vector<16x128xf32>
    %56 = tpu.matmul %55, %0, %cst_17 {dimension_numbers = #tpu.dot_dimension_numbers<[1], [0], [0], [1], [0, 0, 1, 1], [], []>} : vector<16x128xbf16>, vector<128x128xbf16>, vector<16x128xf32> -> vector<16x128xf32>
    %c0_18 = arith.constant 0 : index
    %c0_19 = arith.constant 0 : index
    %57 = vector.load %arg7[%c0_18, %c0_19] : memref<8x128xf32, #tpu.memory_space<vmem>>, vector<8x128xf32>
    %58 = vector.extract_strided_slice %57 {offsets = [0, 0], sizes = [1, 128], strides = [1, 1]} : vector<8x128xf32> to vector<1x128xf32>
    %59 = vector.extract_strided_slice %57 {offsets = [1, 0], sizes = [1, 128], strides = [1, 1]} : vector<8x128xf32> to vector<1x128xf32>
    %60 = vector.extract_strided_slice %57 {offsets = [2, 0], sizes = [1, 128], strides = [1, 1]} : vector<8x128xf32> to vector<1x128xf32>
    %61 = vector.extract_strided_slice %57 {offsets = [3, 0], sizes = [1, 128], strides = [1, 1]} : vector<8x128xf32> to vector<1x128xf32>
    %62 = arith.truncf %56 : vector<16x128xf32> to vector<16x128xbf16>
    %63 = tpu.concatenate %62, %2 in 1 : vector<16x128xbf16>, vector<16x128xbf16> -> vector<16x256xbf16>
    %c0_20 = arith.constant 0 : index
    %c0_21 = arith.constant 0 : index
    %64 = vector.load %arg5[%c0_20, %c0_21] : memref<256x128xbf16, #tpu.memory_space<vmem>>, vector<256x128xbf16>
    %cst_22 = arith.constant dense<0.000000e+00> : vector<16x128xf32>
    %65 = tpu.matmul %63, %64, %cst_22 {dimension_numbers = #tpu.dot_dimension_numbers<[1], [0], [0], [1], [0, 0, 1, 1], [], []>} : vector<16x256xbf16>, vector<256x128xbf16>, vector<16x128xf32> -> vector<16x128xf32>
    %66 = vector.broadcast %58 : vector<1x128xf32> to vector<16x128xf32>
    %67 = arith.addf %65, %66 : vector<16x128xf32>
    %cst_23 = arith.constant 0.000000e+00 : f32
    %68 = vector.broadcast %cst_23 : f32 to vector<16x128xf32>
    %69 = arith.maximumf %67, %68 : vector<16x128xf32>
    %70 = arith.truncf %69 : vector<16x128xf32> to vector<16x128xbf16>
    %c0_24 = arith.constant 0 : index
    %c0_25 = arith.constant 0 : index
    %71 = vector.load %arg6[%c0_24, %c0_25] : memref<128x128xbf16, #tpu.memory_space<vmem>>, vector<128x128xbf16>
    %cst_26 = arith.constant dense<0.000000e+00> : vector<16x128xf32>
    %72 = tpu.matmul %70, %71, %cst_26 {dimension_numbers = #tpu.dot_dimension_numbers<[1], [0], [0], [1], [0, 0, 1, 1], [], []>} : vector<16x128xbf16>, vector<128x128xbf16>, vector<16x128xf32> -> vector<16x128xf32>
    %73 = vector.broadcast %59 : vector<1x128xf32> to vector<16x128xf32>
    %74 = arith.addf %72, %73 : vector<16x128xf32>
    %cst_27 = arith.constant 0.000000e+00 : f32
    %75 = vector.broadcast %cst_27 : f32 to vector<16x128xf32>
    %76 = arith.maximumf %74, %75 : vector<16x128xf32>
    %77 = vector.broadcast %60 : vector<1x128xf32> to vector<16x128xf32>
    %78 = arith.mulf %76, %77 : vector<16x128xf32>
    %79 = vector.broadcast %61 : vector<1x128xf32> to vector<16x128xf32>
    %80 = arith.addf %78, %79 : vector<16x128xf32>
    %c0_28 = arith.constant 0 : index
    %c0_29 = arith.constant 0 : index
    %81 = vector.load %arg8[%c0_28, %c0_29] : memref<16x128xf32, #tpu.memory_space<vmem>>, vector<16x128xf32>
    tpu.vector_store %arg8[%c0_28, %c0_29], %80 {strides = array<i32>} : memref<16x128xf32, #tpu.memory_space<vmem>>, vector<16x128xf32>,
    return
  }
  func.func @transform_0(%arg0: i32) -> (i32, i32) {
    %c0_i32 = arith.constant 0 : i32
    %c0_i32_0 = arith.constant 0 : i32
    %c0_i32_1 = arith.constant 0 : i32
    return %c0_i32, %c0_i32_0 : i32, i32
  }
  func.func @transform_1(%arg0: i32) -> (i32, i32) {
    %c0_i32 = arith.constant 0 : i32
    %c0_i32_0 = arith.constant 0 : i32
    %c0_i32_1 = arith.constant 0 : i32
    return %c0_i32, %c0_i32_0 : i32, i32
  }
  func.func @transform_2(%arg0: i32) -> (i32, i32) {
    %c0_i32 = arith.constant 0 : i32
    %c0_i32_0 = arith.constant 0 : i32
    return %arg0, %c0_i32 : i32, i32
  }
  func.func @transform_3(%arg0: i32) -> (i32, i32) {
    %c0_i32 = arith.constant 0 : i32
    %c0_i32_0 = arith.constant 0 : i32
    return %arg0, %c0_i32 : i32, i32
  }
  func.func @transform_4(%arg0: i32) -> (i32, i32) {
    %c0_i32 = arith.constant 0 : i32
    %c0_i32_0 = arith.constant 0 : i32
    %c0_i32_1 = arith.constant 0 : i32
    return %c0_i32, %c0_i32_0 : i32, i32
  }
  func.func @transform_5(%arg0: i32) -> (i32, i32) {
    %c0_i32 = arith.constant 0 : i32
    %c0_i32_0 = arith.constant 0 : i32
    %c0_i32_1 = arith.constant 0 : i32
    return %c0_i32, %c0_i32_0 : i32, i32
  }
  func.func @transform_6(%arg0: i32) -> (i32, i32) {
    %c0_i32 = arith.constant 0 : i32
    %c0_i32_0 = arith.constant 0 : i32
    %c0_i32_1 = arith.constant 0 : i32
    return %c0_i32, %c0_i32_0 : i32, i32
  }
  func.func @transform_7(%arg0: i32) -> (i32, i32) {
    %c0_i32 = arith.constant 0 : i32
    %c0_i32_0 = arith.constant 0 : i32
    return %arg0, %c0_i32 : i32, i32
  }
}

</mosaic_0001>

<bundles_post_ra>
// kernel: tpu_custom_call.1
= control target key start
LH: loop header
LB: loop body
LE: loop exit
PB: predicated region body
PF: predicated region fallthrough
CT: control target
= control target key end

     0   :  { %12 = vsyncpa [#allocation3], 0  ;;  %s1038_s0 = inlined_call_operand.hbm [shape: bf16[128,128], index: 0, kind: input, shape index: {}]   ;;  %s1039_s1 = inlined_call_operand.vmem [shape: f32[8,128], index: 1, kind: input, shape index: {}]   ;;  %s1040_s2 = inlined_call_operand.vmem [shape: bf16[16,128], index: 2, kind: input, shape index: {}]   ;;  %s1041_s3 = inlined_call_operand.vmem [shape: f32[16,8], index: 3, kind: input, shape index: {}]   ;;  %s1042_s4 = inlined_call_operand.hbm [shape: bf16[256,128], index: 4, kind: input, shape index: {}]   ;;  %s1043_s5 = inlined_call_operand.hbm [shape: bf16[128,128], index: 5, kind: input, shape index: {}]   ;;  %s1044_s6 = inlined_call_operand.vmem [shape: f32[8,128], index: 6, kind: input, shape index: {}]   ;;  %s1045_s7 = inlined_call_operand.hbm [shape: f32[16,128], index: 7, kind: output, shape index: {}]  }
   0x1   :  { %13 = vsyncpa [#allocation6], 0 }
   0x2   :  { %14 = vsyncpa [#allocation4], 0  ;;  %s931_s24 = smov [#allocation5]   ;;  %s932_s26 = smov [#allocation2]  }
   0x3   :  { %s38_s25 = sshll.u32 %s931_s24, 4  ;;  %s20_s27 = sshll.u32 %s932_s26, 4  ;;  %s39_s25 = int_to_ptr.vmem [resolvable:$true] %s38_s25  ;;  %s21_s27 = int_to_ptr.vmem [resolvable:$true] %s20_s27 }
   0x4   :  { %s853_s28 = scalar_lea.vmem %s39_s25, 2048  ;;  %p858_p1 = scmp.lt.s32.totalorder %s39_s25, %s39_s25 }
   0x5   :  { %p854_p0 = scmp.ne.s32.totalorder %s39_s25, %s853_s28  ;;  %p859_p2 = scmp.lt.s32.totalorder %s853_s28, %s853_s28 }
   0x7   :  { %p860_p3 = por %p859_p2, %p858_p1 }
   0x9   :  { %p861_p4 = pnand %p860_p3, %p854_p0 }
   0xb   :  { %864 = shalt.err (!%p861_p4)
}
   0xc   :  { %s933_s29 = smov 64   ;;  %s934_s30 = smov 4  }
   0xd   :  { %44 = dma.hbm_to_vmem [thread:$0]  %s1042_s4, 2048, %s39_s25, [#allocation6], %s933_s29, %s933_s29, %s934_s30  }
   0xe   :  { %s873_s10 = scalar_lea.vmem %s21_s27, 1024  ;;  %p878_p6 = scmp.lt.s32.totalorder %s21_s27, %s21_s27 }
   0xf   :  { %p874_p5 = scmp.ne.s32.totalorder %s21_s27, %s873_s10  ;;  %p879_p7 = scmp.lt.s32.totalorder %s873_s10, %s873_s10 }
  0x11   :  { %p880_p8 = por %p879_p7, %p878_p6 }
  0x13   :  { %p881_p9 = pnand %p880_p8, %p874_p5 }
  0x15   :  { %884 = shalt.err (!%p881_p9)
}
  0x16   :  { %26 = dma.hbm_to_vmem [thread:$0]  %s1038_s0, 1024, %s21_s27, [#allocation3], %s933_s29, %s933_s29, %s934_s30  }
  0x17   :  { %s935_s13 = smov [#allocation7]  }
  0x18   :  { %s50_s14 = sshll.u32 %s935_s13, 4  ;;  %s51_s14 = int_to_ptr.vmem [resolvable:$true] %s50_s14 }
  0x19   :  { %s893_s15 = scalar_lea.vmem %s51_s14, 1024  ;;  %p898_p11 = scmp.lt.s32.totalorder %s51_s14, %s51_s14 }
  0x1a   :  { %p894_p10 = scmp.ne.s32.totalorder %s51_s14, %s893_s15  ;;  %p899_p12 = scmp.lt.s32.totalorder %s893_s15, %s893_s15 }
  0x1c   :  { %p900_p13 = por %p899_p12, %p898_p11 }
  0x1e   :  { %p901_p0 = pnand %p900_p13, %p894_p10 }
  0x20   :  { %904 = shalt.err (!%p901_p0)
}
  0x21   :  { %56 = dma.hbm_to_vmem [thread:$0]  %s1043_s5, 1024, %s51_s14, [#allocation6], %s933_s29, %s933_s29, %s934_s30  }
  0x22   :  { %925 = dma.done.wait [#allocation3], 1024  }
  0x23   :  { %926 = vsyncadd [#allocation3], 4294966272 }
  0x24   :  { %927 = dma.done.wait [#allocation6], 3072  }
  0x25   :  { %928 = vsyncadd [#allocation6], 4294964224  ;;  %v936_v0 = vmov 5   ;;  %vm90_vm0 = vcmask 64512   ;;  %v85_v1 = vld [vmem:[%s1039_s1] sm:$0xff]  ;;  %v89_v3 = vld [vmem:[%s1041_s3 + $0x8] sm:$0xff]  ;;  %v182_v4 = vlaneseq }
  0x26   :  { %795 = vset.pattern.permute.xlu0 %v936_v0  ;;  %v88_v2 = vld [vmem:[%s1041_s3] sm:$0xff]  ;;  %739 = vmatprep.subr.mxu0 %v85_v1  ;;  %v796_v37 = vld [vmem:[#allocation2 + $0x38] sm:$0xff]   ;;  %v937_v38 = vmov 0.0   ;;  %v797_v39 = vld [vmem:[#allocation2 + $0x30] sm:$0xff]   ;;  %vm938_vm9 = vmmov 0  }
  0x27   :  { %741 = vmatprep.mubr.msk.f32.mxu0 %vm90_vm0, %v88_v2  ;;  %740 = vmatpush3.msra.mxu0 %v85_v1  ;;  %v1000_v5 = vshrl.u32 %v182_v4, 7  ;;  %v191_v16 = vand.u32 127, %v182_v4  ;;  %v798_v46 = vld [vmem:[#allocation2 + $0x28] sm:$0xff]   ;;  %v799_v47 = vld [vmem:[#allocation2 + $0x20] sm:$0xff]   ;;  %v800_v48 = vld [vmem:[#allocation2 + $0x18] sm:$0xff]  }
  0x28   :  { %175 = vperm.xlu0 %795, %v88_v2   ;;  %742 = vmatmul.mubr.msk.f32.vlgmr.msra.gmra.mxu0 %vm90_vm0, %v89_v3  ;;  %v801_v49 = vld [vmem:[#allocation2 + $0x10] sm:$0xff]   ;;  %v802_v50 = vld [vmem:[#allocation2 + $0x8] sm:$0xff]   ;;  %v803_v51 = vld [vmem:[#allocation2] sm:$0xff]  }
  0x29   :  { %v184_v7 = vsub.s32 6, %v1000_v5  ;;  %744 = vmatprep.subr.bf16.mxu1 %v937_v38  ;;  %760 = vmatprep.mubr.msk.bf16.mxu1 %vm938_vm9, %v937_v38  ;;  %v804_v52 = vld [vmem:[#allocation5 + $0x78] sm:$0xff]   ;;  %v806_v54 = vld [vmem:[#allocation5 + $0x70] sm:$0xff]   ;;  %v808_v56 = vld [vmem:[#allocation5 + $0x68] sm:$0xff]  }
  0x2a   :  { %745 = vmatpush3.bf16.msra.mxu1 %v796_v37  ;;  %v805_v53 = vld [vmem:[#allocation5 + $0x38] sm:$0xff]   ;;  %708 = vmatprep.subr.bf16.mxu0 %v804_v52  ;;  %v807_v55 = vld [vmem:[#allocation5 + $0x30] sm:$0xff]   ;;  %v809_v57 = vld [vmem:[#allocation5 + $0x28] sm:$0xff]  }
  0x2b   :  { %v185_v8 = vrot.slane %v85_v1, %v184_v7  ;;  %746 = vmatprep.subr.bf16.mxu1 %v937_v38  ;;  %709 = vmatpush3.bf16.msra.mxu0 %v805_v53  ;;  %v810_v58 = vld [vmem:[#allocation5 + $0x60] sm:$0xff]   ;;  %v812_v60 = vld [vmem:[#allocation5 + $0x58] sm:$0xff]   ;;  %v814_v62 = vld [vmem:[#allocation5 + $0x50] sm:$0xff]  }
  0x2c   :  { %179 = vperm.xlu0 %795, %v89_v3   ;;  %710 = vmatprep.subr.bf16.mxu0 %v806_v54  ;;  %v811_v59 = vld [vmem:[#allocation5 + $0x20] sm:$0xff]   ;;  %v813_v61 = vld [vmem:[#allocation5 + $0x18] sm:$0xff]   ;;  %v815_v63 = vld [vmem:[#allocation5 + $0x10] sm:$0xff]  }
  0x2d   :  { %v816_v0 = vld [vmem:[#allocation5 + $0x48] sm:$0xff]  }
  0x2e   :  { %747 = vmatpush3.bf16.msra.mxu1 %v797_v39 }
  0x2f   :  { %748 = vmatprep.subr.bf16.mxu1 %v937_v38  ;;  %711 = vmatpush3.bf16.msra.mxu0 %v807_v55 }
  0x30   :  { %712 = vmatprep.subr.bf16.mxu0 %v808_v56 }
  0x32   :  { %749 = vmatpush3.bf16.msra.mxu1 %v798_v46 }
  0x33   :  { %750 = vmatprep.subr.bf16.mxu1 %v937_v38  ;;  %713 = vmatpush3.bf16.msra.mxu0 %v809_v57 }
  0x34   :  { %714 = vmatprep.subr.bf16.mxu0 %v810_v58 }
  0x36   :  { %751 = vmatpush3.bf16.msra.mxu1 %v799_v47 }
  0x37   :  { %752 = vmatprep.subr.bf16.mxu1 %v937_v38  ;;  %715 = vmatpush3.bf16.msra.mxu0 %v811_v59 }
  0x38   :  { %716 = vmatprep.subr.bf16.mxu0 %v812_v60 }
  0x3a   :  { %753 = vmatpush3.bf16.msra.mxu1 %v800_v48 }
  0x3b   :  { %754 = vmatprep.subr.bf16.mxu1 %v937_v38  ;;  %717 = vmatpush3.bf16.msra.mxu0 %v813_v61 }
  0x3c   :  { %718 = vmatprep.subr.bf16.mxu0 %v814_v62 }
  0x3e   :  { %755 = vmatpush3.bf16.msra.mxu1 %v801_v49 }
  0x3f   :  { %756 = vmatprep.subr.bf16.mxu1 %v937_v38  ;;  %719 = vmatpush3.bf16.msra.mxu0 %v815_v63 }
  0x40   :  { %720 = vmatprep.subr.bf16.mxu0 %v816_v0 }
  0x42   :  { %757 = vmatpush3.bf16.msra.mxu1 %v802_v50 }
  0x43   :  { %758 = vmatprep.subr.bf16.mxu1 %v937_v38 }
  0x46   :  { %759 = vmatpush3.bf16.msra.mxu1 %v803_v51 }
  0x47   :  { %764 = vmatprep.subr.bf16.mxu1 %v937_v38 }
  0xa3   :  { %v176_v6 = vpop.permute.xlu0 %175 }
  0xa4   :  { %vm186_vm1 = vcmp.eq.f32.partialorder %v176_v6, %v185_v8 }
  0xa7   :  { %v180_v9 = vpop.permute.xlu0 %179 }
  0xa8   :  { %vm187_vm2 = vcmp.eq.f32.partialorder %v180_v9, %v185_v8  ;;  %v817_v9 = vld [vmem:[#allocation5 + $0x8] sm:$0xff]  }
  0xa9   :  { %721 = vmatpush3.bf16.msra.mxu0 %v817_v9 }
  0xe8   :  { %v743_v10 = vpop.f32.mrf.mxu0 }
  0xe9   :  { %v173_v11 = vmax.f32 %v743_v10, 1e-16  ;;  %v818_v10 = vld [vmem:[#allocation5 + $0x40] sm:$0xff]  }
  0xea   :  { %v163_v12 = vpop.f32.mrf.mxu0  ;;  %722 = vmatprep.subr.bf16.mxu0 %v818_v10 }
  0xeb   :  { %v172_v13 = vmax.f32 %v163_v12, 1e-16  ;;  %v189_v14 = vsel %vm187_vm2, %v173_v11, 1e+30  ;;  %v819_v11 = vld [vmem:[#allocation5] sm:$0xff]  }
  0xec   :  { %v195_v18 = vand.u32 4294967168, %v189_v14  ;;  %723 = vmatpush3.bf16.msra.mxu0 %v819_v11  ;;  %v820_v12 = vld [vmem:[%s1040_s2] sm:$0xff]   ;;  %v822_v14 = vld [vmem:[#allocation7 + $0x30] sm:$0xff]  }
  0xed   :  { %v188_v15 = vsel %vm186_vm1, %v172_v13, 1e+30  ;;  %506 = vmatprep.mubr.bf16.mxu0 %v820_v12  ;;  %v821_v13 = vld [vmem:[#allocation7 + $0x38] sm:$0xff]  }
  0xee   :  { %v194_v17 = vand.u32 4294967168, %v188_v15  ;;  %v197_v20 = vor.u32 %v195_v18, %v191_v16  ;;  %v823_v15 = vld [vmem:[#allocation7 + $0x28] sm:$0xff]  }
  0xf0   :  { %v196_v19 = vor.u32 %v194_v17, %v191_v16  ;;  %v824_v16 = vld [vmem:[#allocation7 + $0x20] sm:$0xff]  }
  0xf2   :  { %200 = vmin.xlane.f32.xlu1 %v196_v19 }
  0xf6   :  { %202 = vmin.xlane.f32.xlu1 %v197_v20 }
 0x17b   :  { %v201_v21 = vpop.xlane.xlu1 %200 }
 0x17c   :  { %vm204_vm3 = vcmp.eq.f32.partialorder %v196_v19, %v201_v21  ;;  %829 = vrcp.f32 %v201_v21 }
 0x17d   :  { %v210_v22 = vsel %vm204_vm3, 2e+30, %v196_v19 }
 0x17e   :  { %212 = vmin.xlane.f32.xlu0 %v210_v22 }
 0x17f   :  { %v203_v23 = vpop.xlane.xlu1 %202 }
 0x180   :  { %vm205_vm4 = vcmp.eq.f32.partialorder %v197_v20, %v203_v23 }
 0x181   :  { %v211_v24 = vsel %vm205_vm4, 2e+30, %v197_v20 }
 0x182   :  { %214 = vmin.xlane.f32.xlu1 %v211_v24 }
 0x189   :  { %v830_v25 = vpop.eup %829 }
 0x18a   :  { %v208_v26 = vsel %vm204_vm3, %v830_v25, 0.0  ;;  %v828_v25 = vld [vmem:[#allocation7] sm:$0xff]  }
 0x207   :  { %v213_v27 = vpop.xlane.xlu0 %212 }
 0x208   :  { %vm216_vm5 = vcmp.eq.f32.partialorder %v210_v22, %v213_v27  ;;  %831 = vrcp.f32 %v213_v27 }
 0x209   :  { %833 = vrcp.f32 %v203_v23  ;;  %v222_v28 = vsel %vm216_vm5, 2e+30, %v210_v22  ;;  %v825_v22 = vld [vmem:[#allocation7 + $0x18] sm:$0xff]   ;;  %v826_v23 = vld [vmem:[#allocation7 + $0x10] sm:$0xff]  }
 0x20a   :  { %224 = vmin.xlane.f32.xlu1 %v222_v28 }
 0x20b   :  { %v215_v29 = vpop.xlane.xlu1 %214 }
 0x20c   :  { %835 = vrcp.f32 %v215_v29  ;;  %vm217_vm6 = vcmp.eq.f32.partialorder %v211_v24, %v215_v29 }
 0x20d   :  { %v223_v30 = vsel %vm217_vm6, 2e+30, %v211_v24  ;;  %v827_v24 = vld [vmem:[#allocation7 + $0x8] sm:$0xff]  }
 0x20e   :  { %226 = vmin.xlane.f32.xlu1 %v223_v30 }
 0x215   :  { %v832_v31 = vpop.eup %831 }
 0x216   :  { %v834_v32 = vpop.eup %833  ;;  %v220_v33 = vsel %vm216_vm5, %v832_v31, %v208_v26  ;;  %v376_v26 = vsub.s32 0, %v1000_v5 }
 0x217   :  { %v209_v35 = vsel %vm205_vm4, %v834_v32, 0.0 }
 0x219   :  { %v836_v34 = vpop.eup %835 }
 0x21a   :  { %v221_v36 = vsel %vm217_vm6, %v836_v34, %v209_v35 }
 0x293   :  { %v225_v40 = vpop.xlane.xlu1 %224 }
 0x294   :  { %837 = vrcp.f32 %v225_v40  ;;  %vm228_vm7 = vcmp.eq.f32.partialorder %v222_v28, %v225_v40  ;;  %v334_v28 = vld [vmem:[%s1044_s6] sm:$0xff]  ;;  %v536_v40 = vsub.s32 1, %v1000_v5  ;;  %s939_s6 = smov [#allocation8]  }
 0x295   :  { %s648_s22 = sshll.u32 %s939_s6, 4  ;;  %s649_s22 = int_to_ptr.vmem [resolvable:$true] %s648_s22 }
 0x296   :  { %s905_s23 = scalar_lea.vmem %s649_s22, 256  ;;  %p910_p2 = scmp.lt.s32.totalorder %s649_s22, %s649_s22 }
 0x297   :  { %v227_v41 = vpop.xlane.xlu1 %226  ;;  %p906_p1 = scmp.ne.s32.totalorder %s649_s22, %s905_s23  ;;  %p911_p3 = scmp.lt.s32.totalorder %s905_s23, %s905_s23 }
 0x298   :  { %839 = vrcp.f32 %v227_v41  ;;  %vm229_vm8 = vcmp.eq.f32.partialorder %v223_v30, %v227_v41  ;;  %v377_v30 = vrot.slane %v334_v28, %v376_v26  ;;  %v537_v41 = vrot.slane %v334_v28, %v536_v40 }
 0x299   :  { %p912_p4 = por %p911_p3, %p910_p2 }
 0x29b   :  { %p913_p5 = pnand %p912_p4, %p906_p1 }
 0x2a1   :  { %v838_v42 = vpop.eup %837 }
 0x2a2   :  { %v232_v43 = vsel %vm228_vm7, %v838_v42, %v220_v33  ;;  %v631_v42 = vsub.s32 2, %v1000_v5 }
 0x2a3   :  { %234 = vadd.xlane.f32.xlu1 %v232_v43 }
 0x2a4   :  { %v632_v46 = vrot.slane %v334_v28, %v631_v42 }
 0x2a5   :  { %v840_v44 = vpop.eup %839 }
 0x2a6   :  { %v233_v45 = vsel %vm229_vm8, %v840_v44, %v221_v36 }
 0x2a7   :  { %236 = vadd.xlane.f32.xlu1 %v233_v45 }
 0x32c   :  { %v235_v1 = vpop.xlane.xlu1 %234 }
 0x32d   :  { %841 = vrcp.f32 %v235_v1 }
 0x330   :  { %v237_v2 = vpop.xlane.xlu1 %236 }
 0x331   :  { %843 = vrcp.f32 %v237_v2 }
 0x33a   :  { %v842_v3 = vpop.eup %841 }
 0x33b   :  { %v242_v6 = vmul.f32 %v842_v3, %v232_v43  ;;  %v637_v43 = vsub.s32 3, %v1000_v5 }
 0x33d   :  { %v638_v49 = vrot.slane %v334_v28, %v637_v43 }
 0x33e   :  { %v844_v4 = vpop.eup %843 }
 0x33f   :  { %v243_v7 = vmul.f32 %v844_v4, %v233_v45 }
 0x341   :  { %v244_v8 = vpack.c.bf16 %v243_v7, %v242_v6 }
 0x343   :  { %761 = vmatmul.mubr.bf16.vlgmr.msra.gmra.mxu1 %v244_v8 }
 0x344   :  { %780 = vmatprep.mubr.msk.bf16.mxu1 %vm938_vm9, %v937_v38  ;;  %765 = vmatpush3.bf16.msra.mxu1 %v821_v13 }
 0x345   :  { %766 = vmatprep.subr.bf16.mxu1 %v937_v38 }
 0x348   :  { %767 = vmatpush3.bf16.msra.mxu1 %v822_v14 }
 0x349   :  { %768 = vmatprep.subr.bf16.mxu1 %v937_v38 }
 0x34c   :  { %769 = vmatpush3.bf16.msra.mxu1 %v823_v15 }
 0x34d   :  { %770 = vmatprep.subr.bf16.mxu1 %v937_v38 }
 0x350   :  { %771 = vmatpush3.bf16.msra.mxu1 %v824_v16 }
 0x351   :  { %772 = vmatprep.subr.bf16.mxu1 %v937_v38 }
 0x354   :  { %773 = vmatpush3.bf16.msra.mxu1 %v825_v22 }
 0x355   :  { %774 = vmatprep.subr.bf16.mxu1 %v937_v38 }
 0x358   :  { %775 = vmatpush3.bf16.msra.mxu1 %v826_v23 }
 0x359   :  { %776 = vmatprep.subr.bf16.mxu1 %v937_v38 }
 0x35c   :  { %777 = vmatpush3.bf16.msra.mxu1 %v827_v24 }
 0x35d   :  { %778 = vmatprep.subr.bf16.mxu1 %v937_v38 }
 0x360   :  { %779 = vmatpush3.bf16.msra.mxu1 %v828_v25 }
 0x403   :  { %v327_v17 = vpop.f32.mrf.mxu1 }
 0x405   :  { %v762_v18 = vpop.f32.mrf.mxu1 }
 0x407   :  { %v330_v19 = vpop.f32.mrf.mxu1 }
 0x408   :  { %v335_v20 = vpack.c.bf16 %v330_v19, %v327_v17 }
 0x409   :  { %v763_v21 = vpop.f32.mrf.mxu1 }
 0x40a   :  { %507 = vmatmul.mubr.bf16.vlgmr.msra.gmra.mxu0 %v335_v20 }
 0x4ca   :  { %v724_v27 = vpop.f32.mrf.mxu0 }
 0x4cc   :  { %v725_v29 = vpop.f32.mrf.mxu0 }
 0x4cd   :  { %v726_v31 = vadd.f32 %v725_v29, %v724_v27 }
 0x4ce   :  { %v727_v32 = vpop.f32.mrf.mxu0 }
 0x4cf   :  { %v509_v34 = vadd.f32 %v726_v31, %v377_v30 }
 0x4d0   :  { %v728_v33 = vpop.f32.mrf.mxu0 }
 0x4d1   :  { %v729_v35 = vadd.f32 %v728_v33, %v727_v32  ;;  %v515_v37 = vmax.f32 %v509_v34, 0.0 }
 0x4d3   :  { %v512_v36 = vadd.f32 %v729_v35, %v377_v30 }
 0x4d5   :  { %v516_v39 = vmax.f32 %v512_v36, 0.0 }
 0x4d7   :  { %v517_v38 = vpack.c.bf16 %v516_v39, %v515_v37 }
 0x4d9   :  { %781 = vmatmul.mubr.bf16.vlgmr.msra.gmra.mxu1 %v517_v38 }
 0x599   :  { %v620_v44 = vpop.f32.mrf.mxu1 }
 0x59a   :  { %v621_v45 = vadd.f32 %v620_v44, %v537_v41 }
 0x59b   :  { %v782_v47 = vpop.f32.mrf.mxu1 }
 0x59c   :  { %v627_v48 = vmax.f32 %v621_v45, 0.0 }
 0x59d   :  { %v623_v50 = vpop.f32.mrf.mxu1 }
 0x59e   :  { %v633_v51 = vmul.f32 %v632_v46, %v627_v48  ;;  %v624_v52 = vadd.f32 %v623_v50, %v537_v41 }
 0x59f   :  { %v783_v53 = vpop.f32.mrf.mxu1 }
 0x5a0   :  { %v639_v54 = vadd.f32 %v638_v49, %v633_v51  ;;  %v628_v55 = vmax.f32 %v624_v52, 0.0 }
 0x5a2   :  { %641 = vst [vmem:[#allocation8] sm:$0xff] %v639_v54  ;;  %v634_v56 = vmul.f32 %v632_v46, %v628_v55 }
 0x5a4   :  { %v640_v57 = vadd.f32 %v638_v49, %v634_v56 }
 0x5a6   :  { %642 = vst [vmem:[#allocation8 + $0x8] sm:$0xff] %v640_v57 }
 0x5a7   :  { %916 = shalt.err (!%p913_p5)
}
 0x5a8   :  { %s940_s24 = smov 128   ;;  %s941_s25 = smov 8  }
 0x5a9   :  { %654 = dma.vmem_to_hbm [thread:$0]  %s649_s22, 256, %s1045_s7, [#allocation4], %s940_s24, %s940_s24, %s941_s25  }
 0x5aa   :  { %929 = dma.done.wait [#allocation4], 256  }
 0x5ab   :  { %930 = vsyncadd [#allocation4], 4294967040 }
 0x5ac   :  { %658 = vsyncpa [#allocation3], 1 }
 0x5ad   :  { %659 = vsyncpa [#allocation6], 1 }
 0x5ae   :  { %660 = vsyncpa [#allocation4], 1 }

</bundles_post_ra>
